<compile_context>
chip_gen: v7x
topology: tpu7x:2x2x1
jax: 0.10.0
libtpu: 0.0.40
codegen_flags: <defaults>
</compile_context>

<pallas_src>
import functools

import jax
import jax.numpy as jnp
from jax.experimental import pallas as pl
from jax.experimental.pallas import tpu as pltpu


def _lstm_cell_kernel(x_ref, h_ref, c_ref, w_ref, b_ref,
                      h_out_ref, c_out_ref, xh_ref, *,
                      input_size, hidden_size):
    I, H = input_size, hidden_size

    # Assemble the fused matmul operand xh = [x | h] in VMEM, in the weight
    # (matmul) dtype. Elementwise state math below stays f32.
    xh_ref[:, :I] = x_ref[...].astype(xh_ref.dtype)
    xh_ref[:, I:] = h_ref[...].astype(xh_ref.dtype)

    # Single fused matmul: [B, I+H] @ [I+H, 4H] -> [B, 4H], f32 accumulate.
    gates = jnp.dot(xh_ref[...], w_ref[...],
                    preferred_element_type=jnp.float32) + b_ref[...]

    # Full-width nonlinearities on the whole [B, 4H] tile, then pick tanh for
    # the g block (lanes [2H, 3H)) with a lane mask; gate order is i|f|g|o.
    sig = jax.nn.sigmoid(gates)
    th = jnp.tanh(gates)
    lane = jax.lax.broadcasted_iota(jnp.int32, gates.shape, 1)
    is_g = jnp.logical_and(lane >= 2 * H, lane < 3 * H)
    acts = jnp.where(is_g, th, sig)

    i_gate = acts[:, 0 * H:1 * H]
    f_gate = acts[:, 1 * H:2 * H]
    g_gate = acts[:, 2 * H:3 * H]
    o_gate = acts[:, 3 * H:4 * H]

    c_new = f_gate * c_ref[...] + i_gate * g_gate
    h_new = o_gate * jnp.tanh(c_new)

    h_out_ref[...] = h_new.astype(h_out_ref.dtype)
    c_out_ref[...] = c_new.astype(c_out_ref.dtype)


def prepare_lstm_params(weight_ih, weight_hh, bias_ih, bias_hh,
                        param_dtype=jnp.float32):
    """One-time parameter prep (hoist out of any per-step loop).

    weight_ih: [4H, I], weight_hh: [4H, H], bias_*: [4H]  (PyTorch layout,
    gates concatenated i|f|g|o along dim 0).

    Returns:
      w_fused: [I+H, 4H] = [weight_ih.T ; weight_hh.T], cast to param_dtype
               (use jnp.bfloat16 on v6e/v7x to halve DMA/VMEM; f32 accumulate
               in the kernel preserves accuracy).
      b_fused: [1, 4H]   = bias_ih + bias_hh, f32.
    """
    w_fused = jnp.concatenate(
        [weight_ih.T, weight_hh.T], axis=0).astype(param_dtype)
    b_fused = (bias_ih.astype(jnp.float32)
               + bias_hh.astype(jnp.float32)).reshape(1, -1)
    return w_fused, b_fused


def lstm_cell_forward(x, h, c, w_fused, b_fused):
    """Single LSTMCell step. Returns (h_new, c_new), each [B, H] float32."""
    B, I = x.shape
    H = h.shape[1]
    assert w_fused.shape == (I + H, 4 * H)
    assert b_fused.shape == (1, 4 * H)

    kernel = functools.partial(_lstm_cell_kernel, input_size=I, hidden_size=H)
    vmem = pl.BlockSpec(memory_space=pltpu.MemorySpace.VMEM)

    h_new, c_new = pl.pallas_call(
        kernel,
        out_shape=(
            jax.ShapeDtypeStruct((B, H), jnp.float32),
            jax.ShapeDtypeStruct((B, H), jnp.float32),
        ),
        in_specs=[vmem, vmem, vmem, vmem, vmem],
        out_specs=(vmem, vmem),
        scratch_shapes=[pltpu.VMEM((B, I + H), w_fused.dtype)],
        # Reuse the state buffers: h -> h_new, c -> c_new (recurrent drivers
        # avoid fresh HBM allocations / writebacks per step).
        input_output_aliases={1: 0, 2: 1},
    )(x.astype(jnp.float32), h.astype(jnp.float32), c.astype(jnp.float32),
      w_fused, b_fused)
    return h_new, c_new


def _reference(x, h, c, weight_ih, weight_hh, bias_ih, bias_hh):
    wi, wf, wg, wo = jnp.split(weight_ih, 4, axis=0)
    whi, whf, whg, who = jnp.split(weight_hh, 4, axis=0)
    bii, bif, big, bio = jnp.split(bias_ih, 4)
    bhi, bhf, bhg, bho = jnp.split(bias_hh, 4)
    i = jax.nn.sigmoid(x @ wi.T + h @ whi.T + bii + bhi)
    f = jax.nn.sigmoid(x @ wf.T + h @ whf.T + bif + bhf)
    g = jnp.tanh(x @ wg.T + h @ whg.T + big + bhg)
    o = jax.nn.sigmoid(x @ wo.T + h @ who.T + bio + bho)
    c_new = f * c + i * g
    h_new = o * jnp.tanh(c_new)
    return h_new, c_new


if __name__ == "__main__":
    B, I, H = 8, 16, 32   # small shapes; 4H = 128 -> gates fill one vreg

    key = jax.random.PRNGKey(0)
    kx, kh, kc, kwi, kwh, kbi, kbh = jax.random.split(key, 7)

    x = jax.random.normal(kx, (B, I), dtype=jnp.float32)
    h = jax.random.normal(kh, (B, H), dtype=jnp.float32)
    c = jax.random.normal(kc, (B, H), dtype=jnp.float32)

    bound = 1.0 / jnp.sqrt(jnp.float32(H))
    weight_ih = jax.random.uniform(kwi, (4 * H, I), minval=-bound, maxval=bound,
                                   dtype=jnp.float32)
    weight_hh = jax.random.uniform(kwh, (4 * H, H), minval=-bound, maxval=bound,
                                   dtype=jnp.float32)
    bias_ih = jax.random.uniform(kbi, (4 * H,), minval=-bound, maxval=bound,
                                 dtype=jnp.float32)
    bias_hh = jax.random.uniform(kbh, (4 * H,), minval=-bound, maxval=bound,
                                 dtype=jnp.float32)

    # --- f32 weights: exact match against the PyTorch-equivalent reference.
    w32, b32 = prepare_lstm_params(weight_ih, weight_hh, bias_ih, bias_hh,
                                   param_dtype=jnp.float32)
    h32_new, c32_new = lstm_cell_forward(x, h, c, w32, b32)
    jax.block_until_ready((h32_new, c32_new))

    # --- bf16 weights: half the weight DMA / resident VMEM, bf16 MXU path,
    #     f32 accumulation and f32 elementwise (v5e-safe).
    wbf, bbf = prepare_lstm_params(weight_ih, weight_hh, bias_ih, bias_hh,
                                   param_dtype=jnp.bfloat16)
    hbf_new, cbf_new = lstm_cell_forward(x, h, c, wbf, bbf)
    jax.block_until_ready((hbf_new, cbf_new))

    h_ref, c_ref = _reference(x, h, c, weight_ih, weight_hh, bias_ih, bias_hh)

    assert jnp.allclose(h32_new, h_ref, atol=1e-5, rtol=1e-5)
    assert jnp.allclose(c32_new, c_ref, atol=1e-5, rtol=1e-5)
    assert jnp.allclose(hbf_new, h_ref, atol=3e-2, rtol=3e-2)
    assert jnp.allclose(cbf_new, c_ref, atol=3e-2, rtol=3e-2)

    print("KERNEL_OK")
</pallas_src>

<mosaic_0001>
module attributes {stable_mosaic.version = 11 : i64} {
  func.func @_lstm_cell_kernel(%arg0: memref<8x16xf32, #tpu.memory_space<vmem>>, %arg1: memref<8x32xf32, #tpu.memory_space<vmem>>, %arg2: memref<8x32xf32, #tpu.memory_space<vmem>>, %arg3: memref<48x128xf32, #tpu.memory_space<vmem>>, %arg4: memref<1x128xf32, #tpu.memory_space<vmem>>, %arg5: memref<8x32xf32, #tpu.memory_space<vmem>>, %arg6: memref<8x32xf32, #tpu.memory_space<vmem>>, %arg7: memref<8x48xf32, #tpu.memory_space<vmem>>) attributes {dimension_semantics = [], scalar_prefetch = 0 : i64, scratch_operands = 1 : i64, tpu.core_type = #tpu.core_type<tc>} {
    %c0 = arith.constant 0 : index
    %c0_0 = arith.constant 0 : index
    %0 = vector.load %arg0[%c0, %c0_0] : memref<8x16xf32, #tpu.memory_space<vmem>>, vector<8x16xf32>
    %c0_1 = arith.constant 0 : index
    %c0_2 = arith.constant 0 : index
    %1 = vector.load %arg7[%c0_1, %c0_2] : memref<8x48xf32, #tpu.memory_space<vmem>>, vector<8x16xf32>
    tpu.vector_store %arg7[%c0_1, %c0_2], %0 {strides = array<i32>} : memref<8x48xf32, #tpu.memory_space<vmem>>, vector<8x16xf32>,
    %c0_3 = arith.constant 0 : index
    %c0_4 = arith.constant 0 : index
    %2 = vector.load %arg1[%c0_3, %c0_4] : memref<8x32xf32, #tpu.memory_space<vmem>>, vector<8x32xf32>
    %c0_5 = arith.constant 0 : index
    %c16 = arith.constant 16 : index
    %3 = vector.load %arg7[%c0_5, %c16] : memref<8x48xf32, #tpu.memory_space<vmem>>, vector<8x32xf32>
    tpu.vector_store %arg7[%c0_5, %c16], %2 {strides = array<i32>} : memref<8x48xf32, #tpu.memory_space<vmem>>, vector<8x32xf32>,
    %c0_6 = arith.constant 0 : index
    %c0_7 = arith.constant 0 : index
    %4 = vector.load %arg7[%c0_6, %c0_7] : memref<8x48xf32, #tpu.memory_space<vmem>>, vector<8x48xf32>
    %c0_8 = arith.constant 0 : index
    %c0_9 = arith.constant 0 : index
    %5 = vector.load %arg3[%c0_8, %c0_9] : memref<48x128xf32, #tpu.memory_space<vmem>>, vector<48x128xf32>
    %cst = arith.constant dense<0.000000e+00> : vector<8x128xf32>
    %6 = tpu.matmul %4, %5, %cst {dimension_numbers = #tpu.dot_dimension_numbers<[1], [0], [0], [1], [0, 0, 1, 1], [], []>} : vector<8x48xf32>, vector<48x128xf32>, vector<8x128xf32> -> vector<8x128xf32>
    %c0_10 = arith.constant 0 : index
    %c0_11 = arith.constant 0 : index
    %7 = vector.load %arg4[%c0_10, %c0_11] : memref<1x128xf32, #tpu.memory_space<vmem>>, vector<1x128xf32>
    %8 = vector.broadcast %7 : vector<1x128xf32> to vector<8x128xf32>
    %9 = arith.addf %6, %8 : vector<8x128xf32>
    %10 = arith.negf %9 : vector<8x128xf32>
    %11 = math.exp %10 : vector<8x128xf32>
    %cst_12 = arith.constant 1.000000e+00 : f32
    %12 = vector.broadcast %cst_12 : f32 to vector<8x128xf32>
    %13 = arith.addf %12, %11 : vector<8x128xf32>
    %14 = arith.divf %12, %13 : vector<8x128xf32>
    %15 = math.tanh %9 : vector<8x128xf32>
    %16 = tpu.iota {dimensions = array<i32: 1>} : vector<8x128xi32>
    %c64_i32 = arith.constant 64 : i32
    %17 = vector.broadcast %c64_i32 : i32 to vector<8x128xi32>
    %18 = arith.cmpi sge, %16, %17 : vector<8x128xi32>
    %c96_i32 = arith.constant 96 : i32
    %19 = vector.broadcast %c96_i32 : i32 to vector<8x128xi32>
    %20 = arith.cmpi slt, %16, %19 : vector<8x128xi32>
    %21 = arith.andi %18, %20 : vector<8x128xi1>
    %22 = arith.select %21, %15, %14 : vector<8x128xi1>, vector<8x128xf32>
    %23 = vector.extract_strided_slice %22 {offsets = [0, 0], sizes = [8, 32], strides = [1, 1]} : vector<8x128xf32> to vector<8x32xf32>
    %24 = vector.extract_strided_slice %22 {offsets = [0, 32], sizes = [8, 32], strides = [1, 1]} : vector<8x128xf32> to vector<8x32xf32>
    %25 = vector.extract_strided_slice %22 {offsets = [0, 64], sizes = [8, 32], strides = [1, 1]} : vector<8x128xf32> to vector<8x32xf32>
    %26 = vector.extract_strided_slice %22 {offsets = [0, 96], sizes = [8, 32], strides = [1, 1]} : vector<8x128xf32> to vector<8x32xf32>
    %c0_13 = arith.constant 0 : index
    %c0_14 = arith.constant 0 : index
    %27 = vector.load %arg2[%c0_13, %c0_14] : memref<8x32xf32, #tpu.memory_space<vmem>>, vector<8x32xf32>
    %28 = arith.mulf %24, %27 : vector<8x32xf32>
    %29 = arith.mulf %23, %25 : vector<8x32xf32>
    %30 = arith.addf %28, %29 : vector<8x32xf32>
    %31 = math.tanh %30 : vector<8x32xf32>
    %32 = arith.mulf %26, %31 : vector<8x32xf32>
    %c0_15 = arith.constant 0 : index
    %c0_16 = arith.constant 0 : index
    %33 = vector.load %arg5[%c0_15, %c0_16] : memref<8x32xf32, #tpu.memory_space<vmem>>, vector<8x32xf32>
    tpu.vector_store %arg5[%c0_15, %c0_16], %32 {strides = array<i32>} : memref<8x32xf32, #tpu.memory_space<vmem>>, vector<8x32xf32>,
    %c0_17 = arith.constant 0 : index
    %c0_18 = arith.constant 0 : index
    %34 = vector.load %arg6[%c0_17, %c0_18] : memref<8x32xf32, #tpu.memory_space<vmem>>, vector<8x32xf32>
    tpu.vector_store %arg6[%c0_17, %c0_18], %30 {strides = array<i32>} : memref<8x32xf32, #tpu.memory_space<vmem>>, vector<8x32xf32>,
    return
  }
}

</mosaic_0001>

<bundles_post_ra>
// kernel: tpu_custom_call.1
= control target key start
LH: loop header
LB: loop body
LE: loop exit
PB: predicated region body
PF: predicated region fallthrough
CT: control target
= control target key end

     0   :  { %12 = vsyncpa [#allocation4], 0  ;;  %s529_s0 = inlined_call_operand.vmem [shape: f32[8,16], index: 0, kind: input, shape index: {}]   ;;  %s530_s1 = inlined_call_operand.hbm [shape: f32[8,32], index: 1, kind: input, shape index: {}, may-alias: {1,5}]   ;;  %s531_s2 = inlined_call_operand.hbm [shape: f32[8,32], index: 2, kind: input, shape index: {}, may-alias: {2,6}]   ;;  %s532_s3 = inlined_call_operand.hbm [shape: f32[48,128], index: 3, kind: input, shape index: {}]   ;;  %s533_s4 = inlined_call_operand.vmem [shape: f32[1,128], index: 4, kind: input, shape index: {}]   ;;  %s534_s5 = inlined_call_operand.hbm [shape: f32[8,32], index: 5, kind: output, shape index: {0}, may-alias: {1,5}]   ;;  %s535_s6 = inlined_call_operand.hbm [shape: f32[8,32], index: 6, kind: output, shape index: {1}, may-alias: {2,6}]  }
   0x1   :  { %13 = vsyncpa [#allocation7], 0 }
   0x2   :  { %14 = vsyncpa [#allocation5], 0 }
   0x3   :  { %15 = vsyncpa [#allocation11], 0  ;;  %s409_s21 = smov [#allocation6]   ;;  %s410_s23 = smov [#allocation3]  }
   0x4   :  { %s34_s22 = sshll.u32 %s409_s21, 4  ;;  %s24_s24 = sshll.u32 %s410_s23, 4  ;;  %s35_s22 = int_to_ptr.vmem [resolvable:$true] %s34_s22  ;;  %s25_s24 = int_to_ptr.vmem [resolvable:$true] %s24_s24 }
   0x5   :  { %s291_s27 = scalar_lea.hbm %s531_s2, 128 }
   0x6   :  { %p292_p0 = scmp.ne.s32.totalorder %s531_s2, %s291_s27  ;;  %p295_p1 = scmp.lt.u32.totalorder %s291_s27, %s531_s2 }
   0x8   :  { %p297_p2 = pnand %p295_p1, %p292_p0 }
   0xa   :  { %300 = shalt.err (!%p297_p2)
}
   0xb   :  { %s301_s8 = scalar_lea.vmem %s35_s22, 128  ;;  %p306_p4 = scmp.lt.s32.totalorder %s35_s22, %s35_s22 }
   0xc   :  { %p302_p3 = scmp.ne.s32.totalorder %s35_s22, %s301_s8  ;;  %p307_p5 = scmp.lt.s32.totalorder %s301_s8, %s301_s8 }
   0xe   :  { %p308_p6 = por %p307_p5, %p306_p4 }
  0x10   :  { %p309_p7 = pnand %p308_p6, %p302_p3 }
  0x12   :  { %312 = shalt.err (!%p309_p7)
}
  0x13   :  { %37 = dma.hbm_to_vmem [thread:$0]  %s531_s2, 128, %s35_s22, [#allocation7]  }
  0x14   :  { %s313_s13 = scalar_lea.hbm %s530_s1, 128 }
  0x15   :  { %p314_p8 = scmp.ne.s32.totalorder %s530_s1, %s313_s13  ;;  %p317_p9 = scmp.lt.u32.totalorder %s313_s13, %s530_s1 }
  0x17   :  { %p319_p10 = pnand %p317_p9, %p314_p8 }
  0x19   :  { %322 = shalt.err (!%p319_p10)
}
  0x1a   :  { %s323_s18 = scalar_lea.vmem %s25_s24, 128  ;;  %p328_p12 = scmp.lt.s32.totalorder %s25_s24, %s25_s24 }
  0x1b   :  { %p324_p11 = scmp.ne.s32.totalorder %s25_s24, %s323_s18  ;;  %p329_p13 = scmp.lt.s32.totalorder %s323_s18, %s323_s18 }
  0x1d   :  { %p330_p0 = por %p329_p13, %p328_p12 }
  0x1f   :  { %p331_p1 = pnand %p330_p0, %p324_p11 }
  0x21   :  { %334 = shalt.err (!%p331_p1)
}
  0x22   :  { %27 = dma.hbm_to_vmem [thread:$0]  %s530_s1, 128, %s25_s24, [#allocation4]  }
  0x23   :  { %s411_s20 = smov [#allocation8]   ;;  %s335_s25 = scalar_lea.hbm %s532_s3, 768 }
  0x24   :  { %s43_s21 = sshll.u32 %s411_s20, 4  ;;  %p336_p2 = scmp.ne.s32.totalorder %s532_s3, %s335_s25  ;;  %s44_s21 = int_to_ptr.vmem [resolvable:$true] %s43_s21 }
  0x25   :  { %p339_p3 = scmp.lt.u32.totalorder %s335_s25, %s532_s3 }
  0x27   :  { %p341_p4 = pnand %p339_p3, %p336_p2 }
  0x29   :  { %344 = shalt.err (!%p341_p4)
}
  0x2a   :  { %s345_s30 = scalar_lea.vmem %s44_s21, 768  ;;  %p350_p6 = scmp.lt.s32.totalorder %s44_s21, %s44_s21 }
  0x2b   :  { %p346_p5 = scmp.ne.s32.totalorder %s44_s21, %s345_s30  ;;  %p351_p7 = scmp.lt.s32.totalorder %s345_s30, %s345_s30 }
  0x2d   :  { %p352_p8 = por %p351_p7, %p350_p6 }
  0x2f   :  { %p353_p9 = pnand %p352_p8, %p346_p5 }
  0x31   :  { %356 = shalt.err (!%p353_p9)
}
  0x32   :  { %s412_s1 = smov 128   ;;  %s413_s24 = smov 8  }
  0x33   :  { %49 = dma.hbm_to_vmem [thread:$0]  %s532_s3, 768, %s44_s21, [#allocation7], %s412_s1, %s412_s1, %s413_s24  }
  0x34   :  { %401 = dma.done.wait [#allocation4], 128  }
  0x35   :  { %402 = vsyncadd [#allocation4], 4294967168 }
  0x36   :  { %403 = dma.done.wait [#allocation7], 896  }
  0x37   :  { %404 = vsyncadd [#allocation7], 4294966400  ;;  %v414_v0 = vmov 0.0|0.0   ;;  %vm415_vm0 = vmmov 0   ;;  %v416_v1 = vmov 0.0   ;;  %vm62_vm1 = vcmask 130048  }
  0x38   :  { %260 = vmatprep.subr.bf16.mxu0 %v414_v0  ;;  %257 = vmatprep.mubr.msk.f32.mxu0 %vm415_vm0, %v416_v1  ;;  %v64_v2 = vld [vmem:[#allocation3] sm:$0xff]  ;;  %v72_v3 = vld [vmem:[#allocation8] sm:$0xff]  ;;  %v73_v4 = vld [vmem:[#allocation8 + $0x8] sm:$0xff]  ;;  %s417_s9 = smov 16   ;;  %s418_s3 = smov 32   ;;  %vm69_vm2 = vcmask 392320   ;;  %v166_v22 = vlaneseq }
  0x39   :  { %66 = vrot.lane.b32.xlu0 %v64_v2, %s417_s9  ;;  %v261_v5 = vpack.c.bf16 %v73_v4, %v72_v3  ;;  %v61_v6 = vld [vmem:[%s529_s0] sm:$0xff]  ;;  %v74_v7 = vld [vmem:[#allocation8 + $0x10] sm:$0xff]  ;;  %v75_v8 = vld [vmem:[#allocation8 + $0x18] sm:$0xff]  ;;  %vm85_vm3 = vcmask 392192   ;;  %s419_s13 = smov 64   ;;  %s421_s14 = smov [#allocation10]  }
  0x3a   :  { %63 = vst.msk [vmem:[#allocation2] sm:$0xff] %vm62_vm1, %v61_v6  ;;  %v172_v9 = vld [vmem:[#allocation6] sm:$0xff]  ;;  %v264_v10 = vpack.c.bf16 %v75_v8, %v74_v7  ;;  %v76_v11 = vld [vmem:[#allocation8 + $0x20] sm:$0xff]  ;;  %v77_v12 = vld [vmem:[#allocation8 + $0x28] sm:$0xff]  ;;  %v167_v24 = vand.u32 127, %v166_v22  ;;  %s221_s15 = sshll.u32 %s421_s14, 4  ;;  %s222_s15 = int_to_ptr.vmem [resolvable:$true] %s221_s15 }
  0x3b   :  { %262 = vmatpush3.bf16.msra.mxu0 %v261_v5  ;;  %174 = vrot.lane.b32.xlu1 %v172_v9, %s418_s3  ;;  %v267_v13 = vpack.c.bf16 %v77_v12, %v76_v11  ;;  %v235_v16 = vld [vmem:[%s533_s4] ss:$0 sm:$0xff]  ;;  %s420_s4 = smov 96   ;;  %vm198_vm7 = vcmask 261120   ;;  %s357_s16 = scalar_lea.vmem %s222_s15, 128 }
  0x3c   :  { %263 = vmatprep.subr.bf16.mxu0 %v414_v0  ;;  %vm168_vm4 = vcmp.ge.s32.totalorder %v167_v24, 64  ;;  %vm169_vm5 = vcmp.lt.s32.totalorder %v167_v24, 96  ;;  %p358_p10 = scmp.ne.s32.totalorder %s222_s15, %s357_s16  ;;  %p362_p11 = scmp.lt.s32.totalorder %s222_s15, %s222_s15 }
  0x3d   :  { %vm170_vm6 = vmand %vm168_vm4, %vm169_vm5  ;;  %p363_p12 = scmp.lt.s32.totalorder %s357_s16, %s357_s16 }
  0x3f   :  { %265 = vmatpush3.bf16.msra.mxu0 %v264_v10  ;;  %p364_p13 = por %p363_p12, %p362_p11 }
  0x40   :  { %266 = vmatprep.subr.bf16.mxu0 %v414_v0 }
  0x41   :  { %p365_p0 = pnand %p364_p13, %p358_p10 }
  0x43   :  { %268 = vmatpush3.bf16.msra.mxu0 %v267_v13 }
  0xab   :  { %v67_v14 = vpop.permute.xlu0 %66 }
  0xac   :  { %70 = vst.msk [vmem:[#allocation2] sm:$0xff] %vm69_vm2, %v67_v14 }
  0xad   :  { %v175_v30 = vpop.permute.xlu1 %174 }
  0xb3   :  { %v71_v15 = vld [vmem:[#allocation2] sm:$0xff] }
  0xb4   :  { %258 = vmatmul.mubr.msk.f32.vlgmr.msra.gmra.mrb[0].mxu0 %vm85_vm3, %v71_v15 }
 0x187   :  { %v155_v17 = vpop.f32.mrb[0].mxu0 }
 0x188   :  { %v156_v18 = vadd.f32 %v235_v16, %v155_v17  ;;  %v259_v19 = vpop.f32.mrb[1].mxu0 }
 0x18a   :  { %v237_v20 = vmul.f32 -1.442695, %v156_v18 }
 0x18c   :  { %283 = vpow2.f32 %v237_v20 }
 0x18d   :  { %285 = vtanh.f32 %v156_v18 }
 0x196   :  { %v284_v21 = vpop.eup %283 }
 0x197   :  { %v162_v23 = vadd.f32 1.0, %v284_v21  ;;  %v286_v25 = vpop.eup %285 }
 0x199   :  { %287 = vrcp.f32 %v162_v23 }
 0x1a3   :  { %v288_v26 = vpop.eup %287 }
 0x1a4   :  { %v171_v27 = vsel %vm170_vm6, %v286_v25, %v288_v26 }
 0x1a5   :  { %179 = vrot.lane.b32.xlu0 %v171_v27, %s419_s13  ;;  %v177_v31 = vmul.f32 %v175_v30, %v171_v27 }
 0x217   :  { %v180_v28 = vpop.permute.xlu0 %179 }
 0x218   :  { %v182_v29 = vmul.f32 %v180_v28, %v171_v27 }
 0x21a   :  { %184 = vrot.lane.b32.xlu1 %v182_v29, %s418_s3 }
 0x28c   :  { %v185_v32 = vpop.permute.xlu1 %184 }
 0x28d   :  { %v187_v33 = vadd.f32 %v185_v32, %v177_v31 }
 0x28f   :  { %289 = vtanh.f32 %v187_v33 }
 0x299   :  { %v290_v34 = vpop.eup %289 }
 0x29a   :  { %190 = vrot.lane.b32.xlu0 %v290_v34, %s419_s13 }
 0x29e   :  { %201 = vrot.lane.b32.xlu0 %v187_v33, %s420_s4 }
 0x30c   :  { %v191_v35 = vpop.permute.xlu0 %190 }
 0x30d   :  { %v193_v36 = vmul.f32 %v191_v35, %v171_v27 }
 0x30f   :  { %195 = vrot.lane.b32.xlu1 %v193_v36, %s418_s3 }
 0x310   :  { %v202_v37 = vpop.permute.xlu0 %201 }
 0x311   :  { %204 = vst.msk [vmem:[#allocation10] sm:$0xff] %vm198_vm7, %v202_v37 }
 0x312   :  { %368 = shalt.err (!%p365_p0)
}
 0x313   :  { %s369_s2 = scalar_lea.hbm %s535_s6, 128 }
 0x314   :  { %p370_p1 = scmp.ne.s32.totalorder %s535_s6, %s369_s2  ;;  %p373_p2 = scmp.lt.u32.totalorder %s369_s2, %s535_s6 }
 0x316   :  { %p375_p3 = pnand %p373_p2, %p370_p1 }
 0x318   :  { %378 = shalt.err (!%p375_p3)
}
 0x319   :  { %224 = dma.vmem_to_hbm [thread:$0]  %s222_s15, 128, %s535_s6, [#allocation11]  }
 0x31a   :  { %s422_s26 = smov [#allocation9]  }
 0x31b   :  { %s211_s27 = sshll.u32 %s422_s26, 4  ;;  %s212_s27 = int_to_ptr.vmem [resolvable:$true] %s211_s27 }
 0x31c   :  { %s379_s28 = scalar_lea.vmem %s212_s27, 128  ;;  %p384_p5 = scmp.lt.s32.totalorder %s212_s27, %s212_s27 }
 0x31d   :  { %p380_p4 = scmp.ne.s32.totalorder %s212_s27, %s379_s28  ;;  %p385_p6 = scmp.lt.s32.totalorder %s379_s28, %s379_s28 }
 0x31f   :  { %p386_p7 = por %p385_p6, %p384_p5 }
 0x321   :  { %p387_p8 = pnand %p386_p7, %p380_p4 }
 0x381   :  { %v196_v38 = vpop.permute.xlu1 %195 }
 0x382   :  { %199 = vst.msk [vmem:[#allocation9] sm:$0xff] %vm198_vm7, %v196_v38 }
 0x383   :  { %390 = shalt.err (!%p387_p8)
}
 0x384   :  { %s391_s1 = scalar_lea.hbm %s534_s5, 128 }
 0x385   :  { %p392_p9 = scmp.ne.s32.totalorder %s534_s5, %s391_s1  ;;  %p395_p10 = scmp.lt.u32.totalorder %s391_s1, %s534_s5 }
 0x387   :  { %p397_p11 = pnand %p395_p10, %p392_p9 }
 0x389   :  { %400 = shalt.err (!%p397_p11)
}
 0x38a   :  { %214 = dma.vmem_to_hbm [thread:$0]  %s212_s27, 128, %s534_s5, [#allocation5]  }
 0x38b   :  { %405 = dma.done.wait [#allocation5], 128  }
 0x38c   :  { %406 = vsyncadd [#allocation5], 4294967168 }
 0x38d   :  { %407 = dma.done.wait [#allocation11], 128  }
 0x38e   :  { %408 = vsyncadd [#allocation11], 4294967168 }
 0x38f   :  { %231 = vsyncpa [#allocation4], 1 }
 0x390   :  { %232 = vsyncpa [#allocation7], 1 }
 0x391   :  { %233 = vsyncpa [#allocation5], 1 }
 0x392   :  { %234 = vsyncpa [#allocation11], 1 }

</bundles_post_ra>
